<compile_context>
chip_gen: v7x
topology: tpu7x:2x2x1
jax: 0.10.0
libtpu: 0.0.40
codegen_flags: <defaults>
</compile_context>

<pallas_src>
import functools

import jax
import jax.numpy as jnp
from jax.experimental import pallas as pl
from jax.experimental.pallas import tpu as pltpu

LN_EPS = 1e-5  # PyTorch nn.LayerNorm default


def _layer_norm(x, gamma, beta):
    mu = jnp.mean(x, axis=-1, keepdims=True)
    var = jnp.mean(jnp.square(x - mu), axis=-1, keepdims=True)
    return (x - mu) * jax.lax.rsqrt(var + LN_EPS) * gamma + beta


def _gelu_exact(x):
    # nn.GELU() default: exact erf-based GELU (kept for semantic fidelity).
    return 0.5 * x * (1.0 + jax.lax.erf(x * (2.0 ** -0.5)))


def _transformer_kernel(heads, dim_head,
                        x_ref, g1_ref, b1_ref, wqkv_ref, wo_ref,
                        g2_ref, b2_ref, wf1_ref, bf1_ref, wf2_ref, bf2_ref,
                        o_ref, acc_ref):
    """One transformer layer (grid step = (batch sample, layer index))."""
    H, dh = heads, dim_head
    inner = H * dh
    l = pl.program_id(1)

    # Initialize the depth-resident activation from the input at layer 0.
    @pl.when(l == 0)
    def _():
        acc_ref[...] = x_ref[...]

    x = acc_ref[...]                                            # (N, D) f32

    # ---------------- Attention: x = x + Wo(softmax(q k^T) v) on LN(x) -------
    xn = _layer_norm(x, g1_ref[...], b1_ref[...])               # (N, D) f32
    # Single fused lane-dense QKV matmul; scale already folded into Q columns.
    qkv = jnp.dot(xn.astype(jnp.bfloat16), wqkv_ref[...],
                  preferred_element_type=jnp.float32)           # (N, 3*inner) f32

    attn = jnp.zeros_like(x)                                    # (N, D) f32 accumulator
    for h in range(H):                                          # small static unroll over heads
        q_h = qkv[:, h * dh:(h + 1) * dh].astype(jnp.bfloat16)
        k_h = qkv[:, inner + h * dh: inner + (h + 1) * dh].astype(jnp.bfloat16)
        v_h = qkv[:, 2 * inner + h * dh: 2 * inner + (h + 1) * dh].astype(jnp.bfloat16)

        # scores = q_h @ k_h^T (contract last dim of both -> MXU trans_b form)
        dots = jax.lax.dot_general(q_h, k_h, (((1,), (1,)), ((), ())),
                                   preferred_element_type=jnp.float32)   # (N, N) f32
        dots = dots - jnp.max(dots, axis=-1, keepdims=True)
        p = jnp.exp(dots)
        # EUP approximate reciprocal keeps the divide off the VALU path.
        p = p * pl.reciprocal(jnp.sum(p, axis=-1, keepdims=True), approx=True)

        o_h = jnp.dot(p.astype(jnp.bfloat16), v_h,
                      preferred_element_type=jnp.float32)                # (N, dh) f32
        # Per-head slice of Wo^T straight from the (VMEM-resident) weight ref;
        # head contributions accumulate into one (N, D) buffer.
        attn = attn + jnp.dot(o_h.astype(jnp.bfloat16),
                              wo_ref[pl.ds(h * dh, dh), :],
                              preferred_element_type=jnp.float32)        # (N, D) f32
    x = x + attn

    # ---------------- FeedForward: x = x + MLP(LN(x)) (exact GELU) -----------
    yn = _layer_norm(x, g2_ref[...], b2_ref[...])
    hid = jnp.dot(yn.astype(jnp.bfloat16), wf1_ref[...],
                  preferred_element_type=jnp.float32) + bf1_ref[...]     # (N, mlp)
    hid = _gelu_exact(hid)
    x = x + jnp.dot(hid.astype(jnp.bfloat16), wf2_ref[...],
                    preferred_element_type=jnp.float32) + bf2_ref[...]

    acc_ref[...] = x

    @pl.when(l == pl.num_programs(1) - 1)
    def _():
        o_ref[...] = x.astype(o_ref.dtype)


def transformer_forward(x, packed, heads, dim_head):
    """Whole transformer in one pallas_call: grid=(batch, depth), weights streamed per layer."""
    B, N, D = x.shape
    depth = packed["wqkv"].shape[0]

    kernel = functools.partial(_transformer_kernel, heads, dim_head)

    def wspec(arr):
        # Per-layer weight block: streamed (and prefetched) over the depth grid axis.
        nrest = arr.ndim - 1
        return pl.BlockSpec((None,) + arr.shape[1:],
                            lambda b, l, n=nrest: (l,) + (0,) * n)

    weight_args = (packed["g1"], packed["b1"], packed["wqkv"], packed["wo"],
                   packed["g2"], packed["b2"], packed["wf1"], packed["bf1"],
                   packed["wf2"], packed["bf2"])

    return pl.pallas_call(
        kernel,
        out_shape=jax.ShapeDtypeStruct((B, N, D), jnp.float32),
        grid=(B, depth),
        in_specs=[pl.BlockSpec((None, N, D), lambda b, l: (b, 0, 0))]
                 + [wspec(a) for a in weight_args],
        out_specs=pl.BlockSpec((None, N, D), lambda b, l: (b, 0, 0)),
        scratch_shapes=[pltpu.VMEM((N, D), jnp.float32)],   # depth-carried activation
        compiler_params=pltpu.CompilerParams(
            dimension_semantics=("parallel", "arbitrary"),
        ),
    )(x, *weight_args)


# ---------------- one-time parameter packing for the kernel ----------------

def pack_params(layer_params, heads, dim_head):
    """Transpose / fuse / bf16-cast / stack-over-depth once, outside the jitted call."""
    dh = dim_head
    scale = dh ** -0.5

    def qkv_cols(p):
        # PyTorch Linear stores W as (out, in); y = x @ W^T.  Fuse Q|K|V columns,
        # heads laid out contiguously (h*dh + d), attention scale folded into Q.
        return jnp.concatenate([(p["wq"] * scale).T, p["wk"].T, p["wv"].T], axis=1)

    def stack(key):
        return jnp.stack([p[key] for p in layer_params])

    return {
        "g1": stack("g1"),                                                # (depth, 1, D) f32
        "b1": stack("b1"),
        "wqkv": jnp.stack([qkv_cols(p) for p in layer_params]
                          ).astype(jnp.bfloat16),                         # (depth, D, 3*inner) bf16
        "wo": jnp.stack([p["wo"].T for p in layer_params]
                        ).astype(jnp.bfloat16),                           # (depth, inner, D) bf16
        "g2": stack("g2"),
        "b2": stack("b2"),
        "wf1": jnp.stack([p["wf1"].T for p in layer_params]
                         ).astype(jnp.bfloat16),                          # (depth, D, mlp) bf16
        "bf1": stack("bf1"),                                              # (depth, 1, mlp) f32
        "wf2": jnp.stack([p["wf2"].T for p in layer_params]
                         ).astype(jnp.bfloat16),                          # (depth, mlp, D) bf16
        "bf2": stack("bf2"),                                              # (depth, 1, D) f32
    }


# ---------------- deterministic parameter construction (synthetic) ----------------

def _linear_w(key, out_d, in_d):
    return jax.random.normal(key, (out_d, in_d), jnp.float32) * (1.0 / (in_d ** 0.5))


def init_layer_params(key, dim, heads, dim_head, mlp_dim, r_attn, r_ff, deep):
    inner = heads * dim_head
    ki = iter(jax.random.split(key, 32))

    def proj_weight():
        # Effective (inner, dim) weight of the (possibly factorized) bias-free projection.
        if isinstance(r_attn, int):
            mats = [_linear_w(next(ki), r_attn, dim)]
            if deep:
                mats.append(_linear_w(next(ki), r_attn, r_attn))
            mats.append(_linear_w(next(ki), inner, r_attn))
            w = mats[0]
            for m in mats[1:]:
                w = m @ w
            return w
        return _linear_w(next(ki), inner, dim)

    wq, wk, wv = proj_weight(), proj_weight(), proj_weight()
    wo = _linear_w(next(ki), dim, inner)

    g1 = jnp.ones((1, dim), jnp.float32)
    b1 = jnp.zeros((1, dim), jnp.float32)
    g2 = jnp.ones((1, dim), jnp.float32)
    b2 = jnp.zeros((1, dim), jnp.float32)

    if isinstance(r_ff, int) and r_ff != 0:
        if deep:
            # TODO(synk): deep factorized FeedForward (6 linears, no LayerNorm) not composed here.
            raise NotImplementedError("deep=True factorized FeedForward not supported")
        w1 = _linear_w(next(ki), r_ff, dim)
        bb1 = jax.random.normal(next(ki), (r_ff,), jnp.float32) * 0.02
        w2 = _linear_w(next(ki), mlp_dim, r_ff)
        bb2 = jax.random.normal(next(ki), (mlp_dim,), jnp.float32) * 0.02
        w3 = _linear_w(next(ki), r_ff, mlp_dim)
        bb3 = jax.random.normal(next(ki), (r_ff,), jnp.float32) * 0.02
        w4 = _linear_w(next(ki), dim, r_ff)
        bb4 = jax.random.normal(next(ki), (dim,), jnp.float32) * 0.02
        wf1, bf1 = w2 @ w1, w2 @ bb1 + bb2
        wf2, bf2 = w4 @ w3, w4 @ bb3 + bb4
    else:
        wf1 = _linear_w(next(ki), mlp_dim, dim)
        bf1 = jax.random.normal(next(ki), (mlp_dim,), jnp.float32) * 0.02
        wf2 = _linear_w(next(ki), dim, mlp_dim)
        bf2 = jax.random.normal(next(ki), (dim,), jnp.float32) * 0.02

    return dict(g1=g1, b1=b1, wq=wq, wk=wk, wv=wv, wo=wo,
                g2=g2, b2=b2,
                wf1=wf1, bf1=bf1.reshape(1, -1),
                wf2=wf2, bf2=bf2.reshape(1, -1))


# ---------------- pure-JAX reference (for correctness check) ----------------

def transformer_ref(x, layer_params, heads, dim_head):
    scale = dim_head ** -0.5
    B, N, _ = x.shape
    for p in layer_params:
        xn = _layer_norm(x, p["g1"], p["b1"])
        q = xn @ p["wq"].T
        k = xn @ p["wk"].T
        v = xn @ p["wv"].T

        def split(t):
            return t.reshape(B, N, heads, dim_head).transpose(0, 2, 1, 3)

        qh, kh, vh = split(q), split(k), split(v)
        dots = jnp.einsum("bhnd,bhmd->bhnm", qh, kh) * scale
        attn = jax.nn.softmax(dots, axis=-1)
        out = jnp.einsum("bhnm,bhmd->bhnd", attn, vh)
        out = out.transpose(0, 2, 1, 3).reshape(B, N, -1)
        x = x + out @ p["wo"].T

        yn = _layer_norm(x, p["g2"], p["b2"])
        h = _gelu_exact(yn @ p["wf1"].T + p["bf1"])
        x = x + h @ p["wf2"].T + p["bf2"]
    return x


if __name__ == "__main__":
    # Small config consistent with the module's constructor.
    B, N = 2, 8
    dim, depth, heads, dim_head, mlp_dim = 32, 2, 4, 16, 64
    rs_attn = [None, 8]      # layer 0: dense projections, layer 1: rank-8 factorized
    rs_ff = [None, 8]
    deep = False

    key = jax.random.PRNGKey(0)
    kx, kp = jax.random.split(key)
    x = jax.random.normal(kx, (B, N, dim), jnp.float32)
    layer_keys = jax.random.split(kp, depth)
    params = [init_layer_params(layer_keys[l], dim, heads, dim_head, mlp_dim,
                                rs_attn[l], rs_ff[l], deep)
              for l in range(depth)]

    packed = pack_params(params, heads, dim_head)   # one-time transpose / fuse / bf16 cast

    run = jax.jit(functools.partial(transformer_forward, heads=heads, dim_head=dim_head))
    out = jax.block_until_ready(run(x, packed))

    ref = transformer_ref(x, params, heads, dim_head)
    assert out.shape == (B, N, dim)
    assert bool(jnp.all(jnp.isfinite(out)))
    # bf16 matmul operands (f32 accumulation) + approx softmax reciprocal vs a
    # pure-f32 reference: keep a correspondingly loosened tolerance.
    err = float(jnp.max(jnp.abs(out - ref)))
    assert bool(jnp.allclose(out, ref, atol=5e-2, rtol=5e-2)), err
    print("KERNEL_OK")
</pallas_src>

<mosaic_0001>
module attributes {stable_mosaic.version = 11 : i64} {
  func.func @_transformer_kernel(%arg0: i32, %arg1: i32, %arg2: memref<1x8x32xf32, #tpu.memory_space<vmem>>, %arg3: memref<1x1x32xf32, #tpu.memory_space<vmem>>, %arg4: memref<1x1x32xf32, #tpu.memory_space<vmem>>, %arg5: memref<1x32x192xbf16, #tpu.memory_space<vmem>>, %arg6: memref<1x64x32xbf16, #tpu.memory_space<vmem>>, %arg7: memref<1x1x32xf32, #tpu.memory_space<vmem>>, %arg8: memref<1x1x32xf32, #tpu.memory_space<vmem>>, %arg9: memref<1x32x64xbf16, #tpu.memory_space<vmem>>, %arg10: memref<1x1x64xf32, #tpu.memory_space<vmem>>, %arg11: memref<1x64x32xbf16, #tpu.memory_space<vmem>>, %arg12: memref<1x1x32xf32, #tpu.memory_space<vmem>>, %arg13: memref<1x8x32xf32, #tpu.memory_space<vmem>>, %arg14: memref<8x32xf32, #tpu.memory_space<vmem>>) attributes {dimension_semantics = [#tpu.dimension_semantics<parallel>, #tpu.dimension_semantics<arbitrary>], iteration_bounds = array<i64: 2, 2>, scalar_prefetch = 0 : i64, scratch_operands = 1 : i64, tpu.core_type = #tpu.core_type<tc>, window_params = [{transform_indices = @transform_0, window_bounds = array<i64: 1, 8, 32>}, {transform_indices = @transform_1, window_bounds = array<i64: 1, 1, 32>}, {transform_indices = @transform_2, window_bounds = array<i64: 1, 1, 32>}, {transform_indices = @transform_3, window_bounds = array<i64: 1, 32, 192>}, {transform_indices = @transform_4, window_bounds = array<i64: 1, 64, 32>}, {transform_indices = @transform_5, window_bounds = array<i64: 1, 1, 32>}, {transform_indices = @transform_6, window_bounds = array<i64: 1, 1, 32>}, {transform_indices = @transform_7, window_bounds = array<i64: 1, 32, 64>}, {transform_indices = @transform_8, window_bounds = array<i64: 1, 1, 64>}, {transform_indices = @transform_9, window_bounds = array<i64: 1, 64, 32>}, {transform_indices = @transform_10, window_bounds = array<i64: 1, 1, 32>}, {transform_indices = @transform_11, window_bounds = array<i64: 1, 8, 32>}]} {
    %c0_i32 = arith.constant 0 : i32
    %0 = arith.cmpi eq, %arg1, %c0_i32 : i32
    %1 = arith.extui %0 : i1 to i32
    %c0_i32_0 = arith.constant 0 : i32
    %2 = arith.cmpi ne, %1, %c0_i32_0 : i32
    scf.if %2 {
      %c0_77 = arith.constant 0 : index
      %c0_78 = arith.constant 0 : index
      %c0_79 = arith.constant 0 : index
      %187 = vector.load %arg2[%c0_77, %c0_78, %c0_79] : memref<1x8x32xf32, #tpu.memory_space<vmem>>, vector<1x8x32xf32>
      %188 = vector.shape_cast %187 : vector<1x8x32xf32> to vector<8x32xf32>
      %c0_80 = arith.constant 0 : index
      %c0_81 = arith.constant 0 : index
      %189 = vector.load %arg14[%c0_80, %c0_81] : memref<8x32xf32, #tpu.memory_space<vmem>>, vector<8x32xf32>
      tpu.vector_store %arg14[%c0_80, %c0_81], %188 {strides = array<i32>} : memref<8x32xf32, #tpu.memory_space<vmem>>, vector<8x32xf32>,
    } else {
    }
    %c0 = arith.constant 0 : index
    %c0_1 = arith.constant 0 : index
    %3 = vector.load %arg14[%c0, %c0_1] : memref<8x32xf32, #tpu.memory_space<vmem>>, vector<8x32xf32>
    %c0_2 = arith.constant 0 : index
    %c0_3 = arith.constant 0 : index
    %c0_4 = arith.constant 0 : index
    %4 = vector.load %arg3[%c0_2, %c0_3, %c0_4] : memref<1x1x32xf32, #tpu.memory_space<vmem>>, vector<1x1x32xf32>
    %5 = vector.shape_cast %4 : vector<1x1x32xf32> to vector<1x32xf32>
    %c0_5 = arith.constant 0 : index
    %c0_6 = arith.constant 0 : index
    %c0_7 = arith.constant 0 : index
    %6 = vector.load %arg4[%c0_5, %c0_6, %c0_7] : memref<1x1x32xf32, #tpu.memory_space<vmem>>, vector<1x1x32xf32>
    %7 = vector.shape_cast %6 : vector<1x1x32xf32> to vector<1x32xf32>
    %cst = arith.constant dense<0.000000e+00> : vector<8xf32>
    %8 = vector.multi_reduction <add>, %3, %cst [1] : vector<8x32xf32> to vector<8xf32>
    %9 = vector.shape_cast %8 : vector<8xf32> to vector<8x1xf32>
    %cst_8 = arith.constant 3.200000e+01 : f32
    %10 = vector.broadcast %cst_8 : f32 to vector<8x1xf32>
    %11 = arith.divf %9, %10 : vector<8x1xf32>
    %12 = vector.broadcast %11 : vector<8x1xf32> to vector<8x32xf32>
    %13 = arith.subf %3, %12 : vector<8x32xf32>
    %14 = arith.mulf %13, %13 : vector<8x32xf32>
    %cst_9 = arith.constant dense<0.000000e+00> : vector<8xf32>
    %15 = vector.multi_reduction <add>, %14, %cst_9 [1] : vector<8x32xf32> to vector<8xf32>
    %16 = vector.shape_cast %15 : vector<8xf32> to vector<8x1xf32>
    %cst_10 = arith.constant 3.200000e+01 : f32
    %17 = vector.broadcast %cst_10 : f32 to vector<8x1xf32>
    %18 = arith.divf %16, %17 : vector<8x1xf32>
    %19 = vector.broadcast %11 : vector<8x1xf32> to vector<8x32xf32>
    %20 = arith.subf %3, %19 : vector<8x32xf32>
    %cst_11 = arith.constant 9.99999974E-6 : f32
    %21 = vector.broadcast %cst_11 : f32 to vector<8x1xf32>
    %22 = arith.addf %18, %21 : vector<8x1xf32>
    %23 = math.rsqrt %22 : vector<8x1xf32>
    %24 = vector.broadcast %23 : vector<8x1xf32> to vector<8x32xf32>
    %25 = arith.mulf %20, %24 : vector<8x32xf32>
    %26 = vector.broadcast %5 : vector<1x32xf32> to vector<8x32xf32>
    %27 = arith.mulf %25, %26 : vector<8x32xf32>
    %28 = vector.broadcast %7 : vector<1x32xf32> to vector<8x32xf32>
    %29 = arith.addf %27, %28 : vector<8x32xf32>
    %30 = arith.truncf %29 : vector<8x32xf32> to vector<8x32xbf16>
    %c0_12 = arith.constant 0 : index
    %c0_13 = arith.constant 0 : index
    %c0_14 = arith.constant 0 : index
    %31 = vector.load %arg5[%c0_12, %c0_13, %c0_14] : memref<1x32x192xbf16, #tpu.memory_space<vmem>>, vector<1x32x192xbf16>
    %32 = vector.shape_cast %31 : vector<1x32x192xbf16> to vector<32x192xbf16>
    %cst_15 = arith.constant dense<0.000000e+00> : vector<8x192xf32>
    %33 = tpu.matmul %30, %32, %cst_15 {dimension_numbers = #tpu.dot_dimension_numbers<[1], [0], [0], [1], [0, 0, 1, 1], [], []>} : vector<8x32xbf16>, vector<32x192xbf16>, vector<8x192xf32> -> vector<8x192xf32>
    %cst_16 = arith.constant 0.000000e+00 : f32
    %34 = vector.broadcast %cst_16 : f32 to vector<8x32xf32>
    %35 = vector.extract_strided_slice %33 {offsets = [0, 0], sizes = [8, 16], strides = [1, 1]} : vector<8x192xf32> to vector<8x16xf32>
    %36 = arith.truncf %35 : vector<8x16xf32> to vector<8x16xbf16>
    %37 = vector.extract_strided_slice %33 {offsets = [0, 64], sizes = [8, 16], strides = [1, 1]} : vector<8x192xf32> to vector<8x16xf32>
    %38 = arith.truncf %37 : vector<8x16xf32> to vector<8x16xbf16>
    %39 = vector.extract_strided_slice %33 {offsets = [0, 128], sizes = [8, 16], strides = [1, 1]} : vector<8x192xf32> to vector<8x16xf32>
    %40 = arith.truncf %39 : vector<8x16xf32> to vector<8x16xbf16>
    %cst_17 = arith.constant dense<0.000000e+00> : vector<8x8xf32>
    %41 = tpu.matmul %36, %38, %cst_17 {dimension_numbers = #tpu.dot_dimension_numbers<[1], [1], [0], [0], [0, 0, 1, 0], [], []>} : vector<8x16xbf16>, vector<8x16xbf16>, vector<8x8xf32> -> vector<8x8xf32>
    %cst_18 = arith.constant dense<0xFF800000> : vector<8xf32>
    %42 = vector.multi_reduction <maximumf>, %41, %cst_18 [1] : vector<8x8xf32> to vector<8xf32>
    %43 = vector.shape_cast %42 : vector<8xf32> to vector<8x1xf32>
    %44 = vector.broadcast %43 : vector<8x1xf32> to vector<8x8xf32>
    %45 = arith.subf %41, %44 : vector<8x8xf32>
    %46 = math.exp %45 : vector<8x8xf32>
    %cst_19 = arith.constant dense<0.000000e+00> : vector<8xf32>
    %47 = vector.multi_reduction <add>, %46, %cst_19 [1] : vector<8x8xf32> to vector<8xf32>
    %48 = vector.shape_cast %47 : vector<8xf32> to vector<8x1xf32>
    %49 = tpu.reciprocal %48 {approx = true} : vector<8x1xf32> -> vector<8x1xf32>
    %50 = vector.broadcast %49 : vector<8x1xf32> to vector<8x8xf32>
    %51 = arith.mulf %46, %50 : vector<8x8xf32>
    %52 = arith.truncf %51 : vector<8x8xf32> to vector<8x8xbf16>
    %cst_20 = arith.constant dense<0.000000e+00> : vector<8x16xf32>
    %53 = tpu.matmul %52, %40, %cst_20 {dimension_numbers = #tpu.dot_dimension_numbers<[1], [0], [0], [1], [0, 0, 1, 1], [], []>} : vector<8x8xbf16>, vector<8x16xbf16>, vector<8x16xf32> -> vector<8x16xf32>
    %54 = arith.truncf %53 : vector<8x16xf32> to vector<8x16xbf16>
    %c0_21 = arith.constant 0 : index
    %c0_22 = arith.constant 0 : index
    %c0_23 = arith.constant 0 : index
    %55 = vector.load %arg6[%c0_21, %c0_22, %c0_23] : memref<1x64x32xbf16, #tpu.memory_space<vmem>>, vector<1x16x32xbf16>
    %56 = vector.shape_cast %55 : vector<1x16x32xbf16> to vector<16x32xbf16>
    %cst_24 = arith.constant dense<0.000000e+00> : vector<8x32xf32>
    %57 = tpu.matmul %54, %56, %cst_24 {dimension_numbers = #tpu.dot_dimension_numbers<[1], [0], [0], [1], [0, 0, 1, 1], [], []>} : vector<8x16xbf16>, vector<16x32xbf16>, vector<8x32xf32> -> vector<8x32xf32>
    %58 = arith.addf %34, %57 : vector<8x32xf32>
    %59 = vector.extract_strided_slice %33 {offsets = [0, 16], sizes = [8, 16], strides = [1, 1]} : vector<8x192xf32> to vector<8x16xf32>
    %60 = arith.truncf %59 : vector<8x16xf32> to vector<8x16xbf16>
    %61 = vector.extract_strided_slice %33 {offsets = [0, 80], sizes = [8, 16], strides = [1, 1]} : vector<8x192xf32> to vector<8x16xf32>
    %62 = arith.truncf %61 : vector<8x16xf32> to vector<8x16xbf16>
    %63 = vector.extract_strided_slice %33 {offsets = [0, 144], sizes = [8, 16], strides = [1, 1]} : vector<8x192xf32> to vector<8x16xf32>
    %64 = arith.truncf %63 : vector<8x16xf32> to vector<8x16xbf16>
    %cst_25 = arith.constant dense<0.000000e+00> : vector<8x8xf32>
    %65 = tpu.matmul %60, %62, %cst_25 {dimension_numbers = #tpu.dot_dimension_numbers<[1], [1], [0], [0], [0, 0, 1, 0], [], []>} : vector<8x16xbf16>, vector<8x16xbf16>, vector<8x8xf32> -> vector<8x8xf32>
    %cst_26 = arith.constant dense<0xFF800000> : vector<8xf32>
    %66 = vector.multi_reduction <maximumf>, %65, %cst_26 [1] : vector<8x8xf32> to vector<8xf32>
    %67 = vector.shape_cast %66 : vector<8xf32> to vector<8x1xf32>
    %68 = vector.broadcast %67 : vector<8x1xf32> to vector<8x8xf32>
    %69 = arith.subf %65, %68 : vector<8x8xf32>
    %70 = math.exp %69 : vector<8x8xf32>
    %cst_27 = arith.constant dense<0.000000e+00> : vector<8xf32>
    %71 = vector.multi_reduction <add>, %70, %cst_27 [1] : vector<8x8xf32> to vector<8xf32>
    %72 = vector.shape_cast %71 : vector<8xf32> to vector<8x1xf32>
    %73 = tpu.reciprocal %72 {approx = true} : vector<8x1xf32> -> vector<8x1xf32>
    %74 = vector.broadcast %73 : vector<8x1xf32> to vector<8x8xf32>
    %75 = arith.mulf %70, %74 : vector<8x8xf32>
    %76 = arith.truncf %75 : vector<8x8xf32> to vector<8x8xbf16>
    %cst_28 = arith.constant dense<0.000000e+00> : vector<8x16xf32>
    %77 = tpu.matmul %76, %64, %cst_28 {dimension_numbers = #tpu.dot_dimension_numbers<[1], [0], [0], [1], [0, 0, 1, 1], [], []>} : vector<8x8xbf16>, vector<8x16xbf16>, vector<8x16xf32> -> vector<8x16xf32>
    %78 = arith.truncf %77 : vector<8x16xf32> to vector<8x16xbf16>
    %c0_29 = arith.constant 0 : index
    %c16 = arith.constant 16 : index
    %c0_30 = arith.constant 0 : index
    %79 = vector.load %arg6[%c0_29, %c16, %c0_30] : memref<1x64x32xbf16, #tpu.memory_space<vmem>>, vector<1x16x32xbf16>
    %80 = vector.shape_cast %79 : vector<1x16x32xbf16> to vector<16x32xbf16>
    %cst_31 = arith.constant dense<0.000000e+00> : vector<8x32xf32>
    %81 = tpu.matmul %78, %80, %cst_31 {dimension_numbers = #tpu.dot_dimension_numbers<[1], [0], [0], [1], [0, 0, 1, 1], [], []>} : vector<8x16xbf16>, vector<16x32xbf16>, vector<8x32xf32> -> vector<8x32xf32>
    %82 = arith.addf %58, %81 : vector<8x32xf32>
    %83 = vector.extract_strided_slice %33 {offsets = [0, 32], sizes = [8, 16], strides = [1, 1]} : vector<8x192xf32> to vector<8x16xf32>
    %84 = arith.truncf %83 : vector<8x16xf32> to vector<8x16xbf16>
    %85 = vector.extract_strided_slice %33 {offsets = [0, 96], sizes = [8, 16], strides = [1, 1]} : vector<8x192xf32> to vector<8x16xf32>
    %86 = arith.truncf %85 : vector<8x16xf32> to vector<8x16xbf16>
    %87 = vector.extract_strided_slice %33 {offsets = [0, 160], sizes = [8, 16], strides = [1, 1]} : vector<8x192xf32> to vector<8x16xf32>
    %88 = arith.truncf %87 : vector<8x16xf32> to vector<8x16xbf16>
    %cst_32 = arith.constant dense<0.000000e+00> : vector<8x8xf32>
    %89 = tpu.matmul %84, %86, %cst_32 {dimension_numbers = #tpu.dot_dimension_numbers<[1], [1], [0], [0], [0, 0, 1, 0], [], []>} : vector<8x16xbf16>, vector<8x16xbf16>, vector<8x8xf32> -> vector<8x8xf32>
    %cst_33 = arith.constant dense<0xFF800000> : vector<8xf32>
    %90 = vector.multi_reduction <maximumf>, %89, %cst_33 [1] : vector<8x8xf32> to vector<8xf32>
    %91 = vector.shape_cast %90 : vector<8xf32> to vector<8x1xf32>
    %92 = vector.broadcast %91 : vector<8x1xf32> to vector<8x8xf32>
    %93 = arith.subf %89, %92 : vector<8x8xf32>
    %94 = math.exp %93 : vector<8x8xf32>
    %cst_34 = arith.constant dense<0.000000e+00> : vector<8xf32>
    %95 = vector.multi_reduction <add>, %94, %cst_34 [1] : vector<8x8xf32> to vector<8xf32>
    %96 = vector.shape_cast %95 : vector<8xf32> to vector<8x1xf32>
    %97 = tpu.reciprocal %96 {approx = true} : vector<8x1xf32> -> vector<8x1xf32>
    %98 = vector.broadcast %97 : vector<8x1xf32> to vector<8x8xf32>
    %99 = arith.mulf %94, %98 : vector<8x8xf32>
    %100 = arith.truncf %99 : vector<8x8xf32> to vector<8x8xbf16>
    %cst_35 = arith.constant dense<0.000000e+00> : vector<8x16xf32>
    %101 = tpu.matmul %100, %88, %cst_35 {dimension_numbers = #tpu.dot_dimension_numbers<[1], [0], [0], [1], [0, 0, 1, 1], [], []>} : vector<8x8xbf16>, vector<8x16xbf16>, vector<8x16xf32> -> vector<8x16xf32>
    %102 = arith.truncf %101 : vector<8x16xf32> to vector<8x16xbf16>
    %c0_36 = arith.constant 0 : index
    %c32 = arith.constant 32 : index
    %c0_37 = arith.constant 0 : index
    %103 = vector.load %arg6[%c0_36, %c32, %c0_37] : memref<1x64x32xbf16, #tpu.memory_space<vmem>>, vector<1x16x32xbf16>
    %104 = vector.shape_cast %103 : vector<1x16x32xbf16> to vector<16x32xbf16>
    %cst_38 = arith.constant dense<0.000000e+00> : vector<8x32xf32>
    %105 = tpu.matmul %102, %104, %cst_38 {dimension_numbers = #tpu.dot_dimension_numbers<[1], [0], [0], [1], [0, 0, 1, 1], [], []>} : vector<8x16xbf16>, vector<16x32xbf16>, vector<8x32xf32> -> vector<8x32xf32>
    %106 = arith.addf %82, %105 : vector<8x32xf32>
    %107 = vector.extract_strided_slice %33 {offsets = [0, 48], sizes = [8, 16], strides = [1, 1]} : vector<8x192xf32> to vector<8x16xf32>
    %108 = arith.truncf %107 : vector<8x16xf32> to vector<8x16xbf16>
    %109 = vector.extract_strided_slice %33 {offsets = [0, 112], sizes = [8, 16], strides = [1, 1]} : vector<8x192xf32> to vector<8x16xf32>
    %110 = arith.truncf %109 : vector<8x16xf32> to vector<8x16xbf16>
    %111 = vector.extract_strided_slice %33 {offsets = [0, 176], sizes = [8, 16], strides = [1, 1]} : vector<8x192xf32> to vector<8x16xf32>
    %112 = arith.truncf %111 : vector<8x16xf32> to vector<8x16xbf16>
    %cst_39 = arith.constant dense<0.000000e+00> : vector<8x8xf32>
    %113 = tpu.matmul %108, %110, %cst_39 {dimension_numbers = #tpu.dot_dimension_numbers<[1], [1], [0], [0], [0, 0, 1, 0], [], []>} : vector<8x16xbf16>, vector<8x16xbf16>, vector<8x8xf32> -> vector<8x8xf32>
    %cst_40 = arith.constant dense<0xFF800000> : vector<8xf32>
    %114 = vector.multi_reduction <maximumf>, %113, %cst_40 [1] : vector<8x8xf32> to vector<8xf32>
    %115 = vector.shape_cast %114 : vector<8xf32> to vector<8x1xf32>
    %116 = vector.broadcast %115 : vector<8x1xf32> to vector<8x8xf32>
    %117 = arith.subf %113, %116 : vector<8x8xf32>
    %118 = math.exp %117 : vector<8x8xf32>
    %cst_41 = arith.constant dense<0.000000e+00> : vector<8xf32>
    %119 = vector.multi_reduction <add>, %118, %cst_41 [1] : vector<8x8xf32> to vector<8xf32>
    %120 = vector.shape_cast %119 : vector<8xf32> to vector<8x1xf32>
    %121 = tpu.reciprocal %120 {approx = true} : vector<8x1xf32> -> vector<8x1xf32>
    %122 = vector.broadcast %121 : vector<8x1xf32> to vector<8x8xf32>
    %123 = arith.mulf %118, %122 : vector<8x8xf32>
    %124 = arith.truncf %123 : vector<8x8xf32> to vector<8x8xbf16>
    %cst_42 = arith.constant dense<0.000000e+00> : vector<8x16xf32>
    %125 = tpu.matmul %124, %112, %cst_42 {dimension_numbers = #tpu.dot_dimension_numbers<[1], [0], [0], [1], [0, 0, 1, 1], [], []>} : vector<8x8xbf16>, vector<8x16xbf16>, vector<8x16xf32> -> vector<8x16xf32>
    %126 = arith.truncf %125 : vector<8x16xf32> to vector<8x16xbf16>
    %c0_43 = arith.constant 0 : index
    %c48 = arith.constant 48 : index
    %c0_44 = arith.constant 0 : index
    %127 = vector.load %arg6[%c0_43, %c48, %c0_44] : memref<1x64x32xbf16, #tpu.memory_space<vmem>>, vector<1x16x32xbf16>
    %128 = vector.shape_cast %127 : vector<1x16x32xbf16> to vector<16x32xbf16>
    %cst_45 = arith.constant dense<0.000000e+00> : vector<8x32xf32>
    %129 = tpu.matmul %126, %128, %cst_45 {dimension_numbers = #tpu.dot_dimension_numbers<[1], [0], [0], [1], [0, 0, 1, 1], [], []>} : vector<8x16xbf16>, vector<16x32xbf16>, vector<8x32xf32> -> vector<8x32xf32>
    %130 = arith.addf %106, %129 : vector<8x32xf32>
    %131 = arith.addf %3, %130 : vector<8x32xf32>
    %c0_46 = arith.constant 0 : index
    %c0_47 = arith.constant 0 : index
    %c0_48 = arith.constant 0 : index
    %132 = vector.load %arg7[%c0_46, %c0_47, %c0_48] : memref<1x1x32xf32, #tpu.memory_space<vmem>>, vector<1x1x32xf32>
    %133 = vector.shape_cast %132 : vector<1x1x32xf32> to vector<1x32xf32>
    %c0_49 = arith.constant 0 : index
    %c0_50 = arith.constant 0 : index
    %c0_51 = arith.constant 0 : index
    %134 = vector.load %arg8[%c0_49, %c0_50, %c0_51] : memref<1x1x32xf32, #tpu.memory_space<vmem>>, vector<1x1x32xf32>
    %135 = vector.shape_cast %134 : vector<1x1x32xf32> to vector<1x32xf32>
    %cst_52 = arith.constant dense<0.000000e+00> : vector<8xf32>
    %136 = vector.multi_reduction <add>, %131, %cst_52 [1] : vector<8x32xf32> to vector<8xf32>
    %137 = vector.shape_cast %136 : vector<8xf32> to vector<8x1xf32>
    %cst_53 = arith.constant 3.200000e+01 : f32
    %138 = vector.broadcast %cst_53 : f32 to vector<8x1xf32>
    %139 = arith.divf %137, %138 : vector<8x1xf32>
    %140 = vector.broadcast %139 : vector<8x1xf32> to vector<8x32xf32>
    %141 = arith.subf %131, %140 : vector<8x32xf32>
    %142 = arith.mulf %141, %141 : vector<8x32xf32>
    %cst_54 = arith.constant dense<0.000000e+00> : vector<8xf32>
    %143 = vector.multi_reduction <add>, %142, %cst_54 [1] : vector<8x32xf32> to vector<8xf32>
    %144 = vector.shape_cast %143 : vector<8xf32> to vector<8x1xf32>
    %cst_55 = arith.constant 3.200000e+01 : f32
    %145 = vector.broadcast %cst_55 : f32 to vector<8x1xf32>
    %146 = arith.divf %144, %145 : vector<8x1xf32>
    %147 = vector.broadcast %139 : vector<8x1xf32> to vector<8x32xf32>
    %148 = arith.subf %131, %147 : vector<8x32xf32>
    %cst_56 = arith.constant 9.99999974E-6 : f32
    %149 = vector.broadcast %cst_56 : f32 to vector<8x1xf32>
    %150 = arith.addf %146, %149 : vector<8x1xf32>
    %151 = math.rsqrt %150 : vector<8x1xf32>
    %152 = vector.broadcast %151 : vector<8x1xf32> to vector<8x32xf32>
    %153 = arith.mulf %148, %152 : vector<8x32xf32>
    %154 = vector.broadcast %133 : vector<1x32xf32> to vector<8x32xf32>
    %155 = arith.mulf %153, %154 : vector<8x32xf32>
    %156 = vector.broadcast %135 : vector<1x32xf32> to vector<8x32xf32>
    %157 = arith.addf %155, %156 : vector<8x32xf32>
    %158 = arith.truncf %157 : vector<8x32xf32> to vector<8x32xbf16>
    %c0_57 = arith.constant 0 : index
    %c0_58 = arith.constant 0 : index
    %c0_59 = arith.constant 0 : index
    %159 = vector.load %arg9[%c0_57, %c0_58, %c0_59] : memref<1x32x64xbf16, #tpu.memory_space<vmem>>, vector<1x32x64xbf16>
    %160 = vector.shape_cast %159 : vector<1x32x64xbf16> to vector<32x64xbf16>
    %cst_60 = arith.constant dense<0.000000e+00> : vector<8x64xf32>
    %161 = tpu.matmul %158, %160, %cst_60 {dimension_numbers = #tpu.dot_dimension_numbers<[1], [0], [0], [1], [0, 0, 1, 1], [], []>} : vector<8x32xbf16>, vector<32x64xbf16>, vector<8x64xf32> -> vector<8x64xf32>
    %c0_61 = arith.constant 0 : index
    %c0_62 = arith.constant 0 : index
    %c0_63 = arith.constant 0 : index
    %162 = vector.load %arg10[%c0_61, %c0_62, %c0_63] : memref<1x1x64xf32, #tpu.memory_space<vmem>>, vector<1x1x64xf32>
    %163 = vector.shape_cast %162 : vector<1x1x64xf32> to vector<1x64xf32>
    %164 = vector.broadcast %163 : vector<1x64xf32> to vector<8x64xf32>
    %165 = arith.addf %161, %164 : vector<8x64xf32>
    %cst_64 = arith.constant 5.000000e-01 : f32
    %166 = vector.broadcast %cst_64 : f32 to vector<8x64xf32>
    %167 = arith.mulf %166, %165 : vector<8x64xf32>
    %cst_65 = arith.constant 0.707106769 : f32
    %168 = vector.broadcast %cst_65 : f32 to vector<8x64xf32>
    %169 = arith.mulf %165, %168 : vector<8x64xf32>
    %170 = math.erf %169 : vector<8x64xf32>
    %cst_66 = arith.constant 1.000000e+00 : f32
    %171 = vector.broadcast %cst_66 : f32 to vector<8x64xf32>
    %172 = arith.addf %171, %170 : vector<8x64xf32>
    %173 = arith.mulf %167, %172 : vector<8x64xf32>
    %174 = arith.truncf %173 : vector<8x64xf32> to vector<8x64xbf16>
    %c0_67 = arith.constant 0 : index
    %c0_68 = arith.constant 0 : index
    %c0_69 = arith.constant 0 : index
    %175 = vector.load %arg11[%c0_67, %c0_68, %c0_69] : memref<1x64x32xbf16, #tpu.memory_space<vmem>>, vector<1x64x32xbf16>
    %176 = vector.shape_cast %175 : vector<1x64x32xbf16> to vector<64x32xbf16>
    %cst_70 = arith.constant dense<0.000000e+00> : vector<8x32xf32>
    %177 = tpu.matmul %174, %176, %cst_70 {dimension_numbers = #tpu.dot_dimension_numbers<[1], [0], [0], [1], [0, 0, 1, 1], [], []>} : vector<8x64xbf16>, vector<64x32xbf16>, vector<8x32xf32> -> vector<8x32xf32>
    %178 = arith.addf %131, %177 : vector<8x32xf32>
    %c0_71 = arith.constant 0 : index
    %c0_72 = arith.constant 0 : index
    %c0_73 = arith.constant 0 : index
    %179 = vector.load %arg12[%c0_71, %c0_72, %c0_73] : memref<1x1x32xf32, #tpu.memory_space<vmem>>, vector<1x1x32xf32>
    %180 = vector.shape_cast %179 : vector<1x1x32xf32> to vector<1x32xf32>
    %181 = vector.broadcast %180 : vector<1x32xf32> to vector<8x32xf32>
    %182 = arith.addf %178, %181 : vector<8x32xf32>
    %c0_74 = arith.constant 0 : index
    %c0_75 = arith.constant 0 : index
    %183 = vector.load %arg14[%c0_74, %c0_75] : memref<8x32xf32, #tpu.memory_space<vmem>>, vector<8x32xf32>
    tpu.vector_store %arg14[%c0_74, %c0_75], %182 {strides = array<i32>} : memref<8x32xf32, #tpu.memory_space<vmem>>, vector<8x32xf32>,
    %c1_i32 = arith.constant 1 : i32
    %184 = arith.cmpi eq, %arg1, %c1_i32 : i32
    %185 = arith.extui %184 : i1 to i32
    %c0_i32_76 = arith.constant 0 : i32
    %186 = arith.cmpi ne, %185, %c0_i32_76 : i32
    scf.if %186 {
      %c0_77 = arith.constant 0 : index
      %c0_78 = arith.constant 0 : index
      %c0_79 = arith.constant 0 : index
      %187 = vector.load %arg13[%c0_77, %c0_78, %c0_79] : memref<1x8x32xf32, #tpu.memory_space<vmem>>, vector<1x8x32xf32>
      %188 = vector.shape_cast %187 : vector<1x8x32xf32> to vector<8x32xf32>
      %189 = vector.shape_cast %182 : vector<8x32xf32> to vector<1x8x32xf32>
      tpu.vector_store %arg13[%c0_77, %c0_78, %c0_79], %189 {strides = array<i32>} : memref<1x8x32xf32, #tpu.memory_space<vmem>>, vector<1x8x32xf32>,
    } else {
    }
    return
  }
  func.func @transform_0(%arg0: i32, %arg1: i32) -> (i32, i32, i32) {
    %c0_i32 = arith.constant 0 : i32
    %c0_i32_0 = arith.constant 0 : i32
    %c0_i32_1 = arith.constant 0 : i32
    return %arg0, %c0_i32, %c0_i32_0 : i32, i32, i32
  }
  func.func @transform_1(%arg0: i32, %arg1: i32) -> (i32, i32, i32) {
    %c0_i32 = arith.constant 0 : i32
    %c0_i32_0 = arith.constant 0 : i32
    %c0_i32_1 = arith.constant 0 : i32
    return %arg1, %c0_i32, %c0_i32_0 : i32, i32, i32
  }
  func.func @transform_2(%arg0: i32, %arg1: i32) -> (i32, i32, i32) {
    %c0_i32 = arith.constant 0 : i32
    %c0_i32_0 = arith.constant 0 : i32
    %c0_i32_1 = arith.constant 0 : i32
    return %arg1, %c0_i32, %c0_i32_0 : i32, i32, i32
  }
  func.func @transform_3(%arg0: i32, %arg1: i32) -> (i32, i32, i32) {
    %c0_i32 = arith.constant 0 : i32
    %c0_i32_0 = arith.constant 0 : i32
    %c0_i32_1 = arith.constant 0 : i32
    return %arg1, %c0_i32, %c0_i32_0 : i32, i32, i32
  }
  func.func @transform_4(%arg0: i32, %arg1: i32) -> (i32, i32, i32) {
    %c0_i32 = arith.constant 0 : i32
    %c0_i32_0 = arith.constant 0 : i32
    %c0_i32_1 = arith.constant 0 : i32
    return %arg1, %c0_i32, %c0_i32_0 : i32, i32, i32
  }
  func.func @transform_5(%arg0: i32, %arg1: i32) -> (i32, i32, i32) {
    %c0_i32 = arith.constant 0 : i32
    %c0_i32_0 = arith.constant 0 : i32
    %c0_i32_1 = arith.constant 0 : i32
    return %arg1, %c0_i32, %c0_i32_0 : i32, i32, i32
  }
  func.func @transform_6(%arg0: i32, %arg1: i32) -> (i32, i32, i32) {
    %c0_i32 = arith.constant 0 : i32
    %c0_i32_0 = arith.constant 0 : i32
    %c0_i32_1 = arith.constant 0 : i32
    return %arg1, %c0_i32, %c0_i32_0 : i32, i32, i32
  }
  func.func @transform_7(%arg0: i32, %arg1: i32) -> (i32, i32, i32) {
    %c0_i32 = arith.constant 0 : i32
    %c0_i32_0 = arith.constant 0 : i32
    %c0_i32_1 = arith.constant 0 : i32
    return %arg1, %c0_i32, %c0_i32_0 : i32, i32, i32
  }
  func.func @transform_8(%arg0: i32, %arg1: i32) -> (i32, i32, i32) {
    %c0_i32 = arith.constant 0 : i32
    %c0_i32_0 = arith.constant 0 : i32
    %c0_i32_1 = arith.constant 0 : i32
    return %arg1, %c0_i32, %c0_i32_0 : i32, i32, i32
  }
  func.func @transform_9(%arg0: i32, %arg1: i32) -> (i32, i32, i32) {
    %c0_i32 = arith.constant 0 : i32
    %c0_i32_0 = arith.constant 0 : i32
    %c0_i32_1 = arith.constant 0 : i32
    return %arg1, %c0_i32, %c0_i32_0 : i32, i32, i32
  }
  func.func @transform_10(%arg0: i32, %arg1: i32) -> (i32, i32, i32) {
    %c0_i32 = arith.constant 0 : i32
    %c0_i32_0 = arith.constant 0 : i32
    %c0_i32_1 = arith.constant 0 : i32
    return %arg1, %c0_i32, %c0_i32_0 : i32, i32, i32
  }
  func.func @transform_11(%arg0: i32, %arg1: i32) -> (i32, i32, i32) {
    %c0_i32 = arith.constant 0 : i32
    %c0_i32_0 = arith.constant 0 : i32
    %c0_i32_1 = arith.constant 0 : i32
    return %arg0, %c0_i32, %c0_i32_0 : i32, i32, i32
  }
}

</mosaic_0001>

<bundles_post_ra>
// kernel: transformer_forward.1
= control target key start
LH: loop header
LB: loop body
LE: loop exit
PB: predicated region body
PF: predicated region fallthrough
CT: control target
= control target key end

     0   :  { %s2515_s0 = inlined_call_operand.vmem [shape: f32[2,8,32], index: 0, kind: input, shape index: {}]   ;;  %s2516_s1 = inlined_call_operand.vmem [shape: f32[2,1,32], index: 1, kind: input, shape index: {}]   ;;  %s2517_s2 = inlined_call_operand.vmem [shape: f32[2,1,32], index: 2, kind: input, shape index: {}]   ;;  %s2518_s3 = inlined_call_operand.vmem [shape: bf16[2,32,192], index: 3, kind: input, shape index: {}]   ;;  %s2519_s4 = inlined_call_operand.vmem [shape: bf16[2,64,32], index: 4, kind: input, shape index: {}]   ;;  %s2520_s5 = inlined_call_operand.vmem [shape: f32[2,1,32], index: 5, kind: input, shape index: {}]   ;;  %s2521_s6 = inlined_call_operand.vmem [shape: f32[2,1,32], index: 6, kind: input, shape index: {}]   ;;  %s2522_s7 = inlined_call_operand.vmem [shape: bf16[2,32,64], index: 7, kind: input, shape index: {}]   ;;  %s2523_s8 = inlined_call_operand.vmem [shape: f32[2,1,64], index: 8, kind: input, shape index: {}]   ;;  %s2524_s9 = inlined_call_operand.vmem [shape: bf16[2,64,32], index: 9, kind: input, shape index: {}]   ;;  %s2525_s10 = inlined_call_operand.vmem [shape: f32[2,1,32], index: 10, kind: input, shape index: {}]   ;;  %s2526_s11 = inlined_call_operand.hbm [shape: f32[2,8,32], index: 11, kind: output, shape index: {}]  }
   0x1   :  { %2541 = sst [smem:[#allocation18_spill]] %s2515_s0 }
   0x2   :  { %2542 = sst [smem:[#allocation19_spill]] %s2518_s3 }
   0x3   :  { %2543 = sst [smem:[#allocation20_spill]] %s2519_s4 }
   0x4   :  { %2544 = sst [smem:[#allocation21_spill]] %s2526_s11 }
   0x5   :  { %16 = vsyncpa [#allocation4], 0 }
   0x6   :  { %18 = vsyncpa [#allocation4 + $0x1], 0  ;;  %s2170_s17 = smov 0   ;;  %s2172_s18 = smov 0  }
   0x7   :  { %s2174_s19 = smov 0   ;;  %s2176_s20 = smov 0  }
   0x8   :  { %s2178_s21 = smov 0   ;;  %s2180_s22 = smov 0  }
   0x9   :  { %s2182_s23 = smov 0   ;;  %s2184_s24 = smov 0  }
   0xa LB: > { %2545 = sst [smem:[#allocation6_spill]] %s2069_s17  ;;  %s1700_s25 = sadd.s32 4294967295, %s2097_s24   ;;  %s2097_s24 = sphi %s2184_s24, %s24_s24   ;;  %s2093_s23 = sphi %s2182_s23, %s2579_s23   ;;  %s2089_s22 = sphi %s2180_s22, %s2578_s22   ;;  %s2085_s21 = sphi %s2178_s21, %s2577_s21   ;;  %s2081_s20 = sphi %s2176_s20, %s2576_s20   ;;  %s2077_s19 = sphi %s2174_s19, %s2575_s19   ;;  %s2073_s18 = sphi %s2172_s18, %s2574_s18   ;;  %s2069_s17 = sphi %s2170_s17, %s2573_s17  }
   0xb   : > { %2546 = sst [smem:[#allocation7_spill]] %s2073_s18  ;;  %s1701_s26 = sadd.s32 4294967294, %s2097_s24  }
   0xc   : > { %2547 = sst [smem:[#allocation8_spill]] %s2077_s19  ;;  %s33_s27 = sadd.s32 1, %s2089_s22 }
   0xd   : > { %2548 = sst [smem:[#allocation9_spill]] %s2085_s21  ;;  %p34_p0 = scmp.ge.s32.totalorder %s33_s27, 2 }
   0xe   : > { %2549 = sst [smem:[#allocation10_spill]] %s2089_s22  ;;  %s36_s28 = sadd.s32 1, %s2093_s23 }
   0xf   : > { %2550 = sst [smem:[#allocation11_spill]] %s2093_s23  ;;  %p339_p1 = scmp.ne.s32.totalorder %s2077_s19, %s2073_s18 }
  0x10   : > { %2551 = sst [smem:[#allocation12_spill]] %s2097_s24  ;;  %p340_p2 = scmp.eq.s32.totalorder %s1700_s25, 3 }
  0x11   : > { %s2581_s27 = smov (%p34_p0, %s33_s27), 0  ;;  %s2583_s28 = smov (!%p34_p0, %s36_s28), %s2093_s23 }
  0x12   : > { %2552 = sst [smem:[#allocation13_spill]] %s2581_s27  ;;  %p2219_p3 = por %p340_p2, %p339_p1 }
  0x13   : > { %p345_p4 = scmp.ne.s32.totalorder %s2073_s18, %s2069_s17  ;;  %p38_p5 = scmp.ge.s32.totalorder %s2583_s28, 2 }
  0x14   : > { %s2553_s29 = scalar_select %p2219_p3, 1, 0 }
  0x15   : > { %p346_p6 = scmp.eq.s32.totalorder %s1701_s26, 3  ;;  %p1704_p7 = scmp.ge.s32.totalorder %s2097_s24, 1 }
  0x16   : > { %2554 = sst [smem:[#allocation14_spill]] %s2553_s29  ;;  %p439_p8 = scmp.lt.s32.totalorder %s2097_s24, 5 }
  0x17   : > { %s2585_s28 = smov (%p38_p5, %s2583_s28), 0  ;;  %p2229_p9 = por %p346_p6, %p345_p4 }
  0x18   : > { %2555 = sst [smem:[#allocation15_spill]] %s2585_s28  ;;  %p440_p10 = pnand %p1704_p7, %p439_p8 }
  0x19   : > { %s2556_s30 = scalar_select %p2229_p9, 1, 0 }
  0x1a   : > { %s326_s12 = ssub.s32 %s2093_s23, %s2585_s28  ;;  %s329_s13 = sadd.s32 1, %s2077_s19 }
  0x1b   : > { %2557 = sst [smem:[#allocation16_spill]] %s2556_s30  ;;  %p327_p11 = scmp.eq.s32.totalorder %s326_s12, 0 }
  0x1c   : > { %443 = sbr.rel (%p440_p10) target bundleno = 3743 (0xe9f), region = 64  ;;  %s2528_s15 = sand.u32 (!%p440_p10), 1, %s2073_s18  }
  0x1d   : > { %s2237_s14 = scalar_select %p327_p11, %s2077_s19, %s329_s13  }
  0x1e   : > { %p516_p12 = scmp.lt.s32.totalorder (!%p440_p10), %s2085_s21, 1  ;;  %s2243_s16 = sshll.u32 (!%p440_p10), %s2528_s15, 3 }
  0x1f   : > { %2558 = sst [smem:[#allocation17_spill]] %s2237_s14  ;;  %p520_p13 = scmp.lt.s32.totalorder (!%p440_p10), %s2081_s20, 1 }
  0x20   : > { %s2559_s0 = sld [smem:[#allocation18_spill]] (!%p440_p10)  ;;  %s2560_s3 = sld [smem:[#allocation19_spill]] (!%p440_p10) }
  0x21   : > { %s2561_s4 = sld [smem:[#allocation20_spill]] (!%p440_p10)  ;;  %s515_s13 = scalar_lea.vmem (!%p440_p10), [#allocation3], %s2243_s16 }
  0x22   : > { %p1715_p0 = scmp.ne.s32.totalorder (!%p440_p10), %s2081_s20, 0 }
  0x23   : > { %s517_s25 = scalar_select %p516_p12, %s2085_s21, 1 }
  0x24   : > { %s2248_s26 = scalar_select %p520_p13, %s2081_s20, 1 }
  0x25   : > { %s1706_s12 = sshll.u32 %s517_s25, 3  ;;  %562 = sbr.rel (%p1715_p0) target bundleno = 44 (0x2c), region = 68  ;;  %vm564_vm0 = vcmask (!%p1715_p0), 261120  }
  0x26   : > { %s519_s27 = scalar_lea.vmem %s2559_s0, %s1706_s12  ;;  %s1756_s17 = sshll.u32 %s2248_s26, 5 }
  0x27   : > { %s2265_s29 = scalar_lea.vmem %s2560_s3, %s1756_s17  ;;  %s2270_s21 = scalar_lea.vmem %s2561_s4, %s1756_s17  ;;  %v563_v0 = vld [vmem:[%s519_s27] sm:$0xff] (!%p1715_p0) }
  0x28   : > { %s538_s23 = scalar_lea.vmem %s2520_s5, %s2248_s26  ;;  %s541_s19 = scalar_lea.vmem %s2521_s6, %s2248_s26  ;;  %565 = vst.msk [vmem:[#allocation2] sm:$0xff] (!%p1715_p0), %vm564_vm0, %v563_v0 }
  0x29   : > { %s1758_s14 = sshll.u32 %s2248_s26, 4  ;;  %s549_s11 = scalar_lea.vmem %s2523_s8, %s2248_s26 }
  0x2a   : > { %s2288_s3 = scalar_lea.vmem %s2522_s7, %s1758_s14  ;;  %s2293_s4 = scalar_lea.vmem %s2524_s9, %s1756_s17 }
  0x2b   : > { %s557_s15 = scalar_lea.vmem %s2525_s10, %s2248_s26 }
  0x2c PF: > { %vm569_vm1 = vcmask 261120   ;;  %v1965_v8 = vld [vmem:[%s2265_s29 + $0x4] ss:$8 sps:$4 sm:$0xff]   ;;  %v1967_v9 = vld [vmem:[%s2265_s29] ss:$8 sps:$4 sm:$0xff]   ;;  %v2099_v11 = vmov 0   ;;  %s2562_s22 = scalar_lea.vmem %s2516_s1, %s2248_s26  ;;  %s2563_s14 = scalar_lea.vmem %s2517_s2, %s2248_s26 }
  0x2d   : > { %v1968_v10 = vld [vmem:[%s2265_s29 + $0x14] ss:$8 sps:$4 sm:$0xff]   ;;  %626 = vmatprep.subr.bf16.mxu1 %v1965_v8  ;;  %658 = vmatprep.mubr.bf16.mxu1 %v2099_v11  ;;  %v1970_v12 = vld [vmem:[%s2265_s29 + $0x10] ss:$8 sps:$4 sm:$0xff]   ;;  %v1716_v17 = vld [vmem:[%s2562_s22] ss:$0 sm:$0xff] }
  0x2e   : > { %627 = vmatpush1.bf16.msra.mxu1 %v1967_v9  ;;  %v1717_v19 = vld [vmem:[%s2563_s14] ss:$0 sm:$0xff]  ;;  %v2100_v23 = vmov 0.0   ;;  %vm2101_vm2 = vmmov 0   ;;  %vm735_vm3 = vcmask 1043456   ;;  %s2102_s29 = smov 112  }
  0x2f   : > { %v2301_v1 = vld [vmem:[#allocation2] sm:$0xff]  ;;  %628 = vmatprep.subr.bf16.mxu1 %v1968_v10  ;;  %1798 = vmatprep.subr.bf16.mxu0 %v2100_v23  ;;  %s2103_s24 = smov 64   ;;  %s2104_s18 = smov 48   ;;  %vm672_vm4 = vcmask 130048   ;;  %vm719_vm5 = vcmask 64512   ;;  %vm1455_vm6 = vcmask 523264  }
  0x30   : > { %v570_v2 = vsel %vm569_vm1, %v2301_v1, 0.0  ;;  %1800 = vmatprep.mubr.msk.bf16.mxu0 %vm2101_vm2, %v2100_v23  ;;  %s2105_s25 = smov 32   ;;  %s2106_s28 = smov 96  }
  0x31   : > { %571 = vadd.xlane.f32.xlu0 %v570_v2  ;;  %s2107_s12 = smov 80   ;;  %s2108_s0 = smov 16  }
  0x32   : > { %629 = vmatpush1.bf16.msra.mxu1 %v1970_v12  ;;  %p1751_p1 = scmp.ne.s32.totalorder %s2081_s20, 1 }
  0x33   : > { %1792 = vmatprep.subr.bf16.mxu1 %v2100_v23 }
  0xbe   : > { %v572_v3 = vpop.xlane.xlu0 %571 }
  0xbf   : > { %v574_v4 = vmul.f32 0.03125, %v572_v3  ;;  %v1971_v3 = vld [vmem:[%s2270_s21] sm:$0xff]  }
  0xc1   : > { %v575_v5 = vsub.f32 %v2301_v1, %v574_v4  ;;  %v1972_v4 = vld [vmem:[%s2270_s21 + $0x8] sm:$0xff]  }
  0xc3   : > { %v576_v6 = vmul.f32 %v575_v5, %v575_v5 }
  0xc5   : > { %v577_v7 = vsel %vm569_vm1, %v576_v6, 0.0 }
  0xc6   : > { %578 = vadd.xlane.f32.xlu0 %v577_v7 }
 0x153   : > { %v579_v13 = vpop.xlane.xlu0 %578 }
 0x154   : > { %v580_v14 = vmul.f32 0.03125, %v579_v13 }
 0x156   : > { %v581_v15 = vadd.f32 1e-05, %v580_v14 }
 0x158   : > { %1981 = vrsqrt.f32 %v581_v15 }
 0x162   : > { %v1982_v16 = vpop.eup %1981 }
 0x163   : > { %v583_v18 = vmul.f32 %v1982_v16, %v575_v5 }
 0x165   : > { %v590_v20 = vmul.f32 %v1716_v17, %v583_v18 }
 0x167   : > { %v597_v21 = vadd.f32 %v1717_v19, %v590_v20 }
 0x169   : > { %v598_v22 = vpack.c.bf16 %v597_v21, %v597_v21 }
 0x16b   : > { %1722 = vmatmul.mubr.msk.bf16.vlgmr.msra.gmra.mrb[0].mxu1 %vm569_vm1, %v598_v22 }
 0x16c   : > { %1794 = vmatprep.mubr.msk.bf16.mxu1 %vm2101_vm2, %v2100_v23 }
 0x23e   : > { %v660_v24 = vpop.f32.mrb[0].mxu1 }
 0x23f   : > { %v2328_v25 = vpack.c.bf16 %v660_v24, %v660_v24  ;;  %v662_v26 = vpop.f32.mrb[1].mxu1 }
 0x240   : > { %v2330_v27 = vpack.c.bf16 %v662_v26, %v662_v26  ;;  %v664_v28 = vpop.f32.mrb[2].mxu1 }
 0x241   : > { %782 = vrot.lane.b32.xlu0 %v2328_v25, %s2102_s29  ;;  %670 = vrot.lane.b32.xlu1 %v2328_v25, %s2103_s24  ;;  %v665_v29 = vpop.f32.mrb[3].mxu1 }
 0x242   : > { %v737_v30 = vsel %vm735_vm3, %v2330_v27, 0 }
 0x243   : > { %1799 = vmatpush3.bf16.msra.mxu0 %v737_v30 }
 0x244   : > { %1810 = vmatprep.subr.bf16.mxu0 %v2100_v23 }
 0x245   : > { %784 = vrot.lane.b32.xlu1 %v2328_v25, %s2104_s18 }
 0x2b3   : > { %v671_v31 = vpop.permute.xlu1 %670  ;;  %v783_v35 = vpop.permute.xlu0 %782 }
 0x2b4   : > { %v677_v32 = vsel %vm672_vm4, %v671_v31, 0 }
 0x2b5   : > { %1793 = vmatpush3.bf16.xpose.msra.mxu1 %v677_v32 }
 0x2b6   : > { %1804 = vmatprep.subr.bf16.mxu1 %v2100_v23 }
 0x2b7   : > { %v785_v33 = vpop.permute.xlu1 %784 }
 0x2b8   : > { %v790_v34 = vsel %vm672_vm4, %v785_v33, 0 }
 0x2bc   : > { %1795 = vmatmul.mubr.msk.bf16.vlgmr.msra.gmra.mrb[4].mxu1 %vm672_vm4, %v2328_v25 }
 0x2bd   : > { %1805 = vmatpush3.bf16.xpose.msra.mxu1 %v790_v34  ;;  %1806 = vmatprep.mubr.msk.bf16.mxu1 %vm2101_vm2, %v2100_v23 }
 0x2be   : > { %1816 = vmatprep.subr.bf16.mxu1 %v2100_v23 }
 0x2c4   : > { %1807 = vmatmul.mubr.msk.bf16.vlgmr.msra.gmra.mrb[8].mxu1 %vm672_vm4, %v783_v35 }
 0x2c5   : > { %1818 = vmatprep.mubr.msk.bf16.mxu1 %vm2101_vm2, %v2100_v23  ;;  %1817 = vmatpush3.bf16.msra.mxu1 %v1972_v4 }
 0x2c6   : > { %1828 = vmatprep.subr.bf16.mxu1 %v2100_v23 }
 0x38f   : > { %v713_v36 = vpop.f32.mrb[4].mxu1 }
 0x390   : > { %v1796_v37 = vpop.f32.mrb[5].mxu1  ;;  %v720_v38 = vsel %vm719_vm5, %v713_v36, -inf }
 0x391   : > { %721 = vmax.xlane.f32.xlu1 %v720_v38  ;;  %v716_v39 = vpop.f32.mrb[6].mxu1 }
 0x392   : > { %v1797_v40 = vpop.f32.mrb[7].mxu1 }
 0x397   : > { %v826_v41 = vpop.f32.mrb[8].mxu1 }
 0x398   : > { %v1808_v42 = vpop.f32.mrb[9].mxu1  ;;  %v832_v43 = vsel %vm719_vm5, %v826_v41, -inf }
 0x399   : > { %833 = vmax.xlane.f32.xlu0 %v832_v43  ;;  %v829_v44 = vpop.f32.mrb[10].mxu1 }
 0x39a   : > { %v1809_v45 = vpop.f32.mrb[11].mxu1 }
 0x3af   : > { %996 = vrot.lane.b32.xlu0 %v2328_v25, %s2105_s25 }
 0x41e   : > { %v722_v46 = vpop.xlane.xlu1 %721 }
 0x41f   : > { %v723_v47 = vsub.f32 %v713_v36, %v722_v46 }
 0x421   : > { %v724_v48 = vmul.f32 1.442695, %v723_v47 }
 0x423   : > { %1983 = vpow2.f32 %v724_v48 }
 0x426   : > { %v834_v49 = vpop.xlane.xlu0 %833 }
 0x427   : > { %v835_v50 = vsub.f32 %v826_v41, %v834_v49 }
 0x429   : > { %v836_v51 = vmul.f32 1.442695, %v835_v50 }
 0x42a   : > { %v997_v10 = vpop.permute.xlu0 %996 }
 0x42b   : > { %1985 = vpow2.f32 %v836_v51  ;;  %v1002_v15 = vsel %vm672_vm4, %v997_v10, 0 }
 0x42d   : > { %v1984_v52 = vpop.eup %1983 }
 0x42e   : > { %v726_v53 = vsel %vm719_vm5, %v1984_v52, 0.0 }
 0x42f   : > { %727 = vadd.xlane.f32.xlu1 %v726_v53 }
 0x435   : > { %v1986_v54 = vpop.eup %1985 }
 0x436   : > { %v838_v55 = vsel %vm719_vm5, %v1986_v54, 0.0 }
 0x437   : > { %839 = vadd.xlane.f32.xlu1 %v838_v55 }
 0x448   : > { %845 = vrot.lane.b32.xlu1 %v2330_v27, %s2102_s29 }
 0x44c   : > { %994 = vrot.lane.b32.xlu1 %v2328_v25, %s2106_s28 }
 0x4bc   : > { %v728_v56 = vpop.xlane.xlu1 %727 }
 0x4bd   : > { %1987 = vrcp.f32 %v728_v56 }
 0x4c4   : > { %v840_v57 = vpop.xlane.xlu1 %839 }
 0x4c5   : > { %1989 = vrcp.f32 %v840_v57 }
 0x4c7   : > { %v1988_v58 = vpop.eup %1987 }
 0x4c8   : > { %v730_v59 = vmul.f32 %v1988_v58, %v1984_v52  ;;  %v846_v60 = vpop.permute.xlu1 %845 }
 0x4c9   : > { %v851_v62 = vsel %vm735_vm3, %v846_v60, 0 }
 0x4ca   : > { %v731_v61 = vpack.c.bf16 %v730_v59, %v730_v59 }
 0x4cc   : > { %1801 = vmatmul.mubr.msk.bf16.vlgmr.msra.gmra.mrb[0].mxu0 %vm719_vm5, %v731_v61  ;;  %v995_v17 = vpop.permute.xlu1 %994 }
 0x4cd   : > { %1811 = vmatpush3.bf16.msra.mxu0 %v851_v62  ;;  %1812 = vmatprep.mubr.msk.bf16.mxu0 %vm2101_vm2, %v2100_v23 }
 0x4ce   : > { %1822 = vmatprep.subr.bf16.mxu0 %v2100_v23 }
 0x4cf   : > { %v1990_v63 = vpop.eup %1989 }
 0x4d0   : > { %v842_v0 = vmul.f32 %v1990_v63, %v1986_v54 }
 0x4d2   : > { %v843_v2 = vpack.c.bf16 %v842_v0, %v842_v0 }
 0x4d4   : > { %1813 = vmatmul.mubr.msk.bf16.vlgmr.msra.gmra.mrb[4].mxu0 %vm719_vm5, %v843_v2 }
 0x4d5   : > { %1824 = vmatprep.mubr.msk.bf16.mxu0 %vm2101_vm2, %v2100_v23  ;;  %1823 = vmatpush3.bf16.msra.mxu0 %v1971_v3  ;;  %v1974_v3 = vld [vmem:[%s2270_s21 + $0x18] sm:$0xff]  }
 0x4d6   : > { %1834 = vmatprep.subr.bf16.mxu0 %v2100_v23 }
 0x59f   : > { %v773_v5 = vpop.f32.mrb[0].mxu0 }
 0x5a0   : > { %v779_v6 = vpack.c.bf16 %v773_v5, %v773_v5  ;;  %v1802_v7 = vpop.f32.mrb[1].mxu0 }
 0x5a1   : > { %v776_v8 = vpop.f32.mrb[2].mxu0 }
 0x5a2   : > { %v1803_v9 = vpop.f32.mrb[3].mxu0  ;;  %1825 = vmatmul.mubr.msk.bf16.vlgmr.msra.gmra.mrb[8].mxu0 %vm672_vm4, %v779_v6 }
 0x5a3   : > { %1836 = vmatprep.mubr.msk.bf16.mxu0 %vm2101_vm2, %v2100_v23 }
 0x5a7   : > { %v887_v11 = vpop.f32.mrb[4].mxu0 }
 0x5a8   : > { %v893_v12 = vpack.c.bf16 %v887_v11, %v887_v11  ;;  %v1814_v13 = vpop.f32.mrb[5].mxu0 }
 0x5a9   : > { %v890_v14 = vpop.f32.mrb[6].mxu0 }
 0x5aa   : > { %v1815_v16 = vpop.f32.mrb[7].mxu0  ;;  %1819 = vmatmul.mubr.msk.bf16.vlgmr.msra.gmra.mrb[12].mxu1 %vm672_vm4, %v893_v12 }
 0x5ab   : > { %1829 = vmatpush3.bf16.xpose.msra.mxu1 %v1002_v15  ;;  %1830 = vmatprep.mubr.msk.bf16.mxu1 %vm2101_vm2, %v2100_v23 }
 0x5ac   : > { %1840 = vmatprep.subr.bf16.mxu1 %v2100_v23 }
 0x5b2   : > { %1831 = vmatmul.mubr.msk.bf16.vlgmr.msra.gmra.mrb[16].mxu1 %vm672_vm4, %v995_v17 }
 0x5b3   : > { %1842 = vmatprep.mubr.msk.bf16.mxu1 %vm2101_vm2, %v2100_v23 }
 0x675   : > { %v988_v18 = vpop.f32.mrb[8].mxu0 }
 0x676   : > { %v1826_v19 = vpop.f32.mrb[9].mxu0 }
 0x677   : > { %v991_v20 = vpop.f32.mrb[10].mxu0 }
 0x678   : > { %v1827_v21 = vpop.f32.mrb[11].mxu0 }
 0x67d   : > { %v939_v22 = vpop.f32.mrb[12].mxu1 }
 0x67e   : > { %v2382_v24 = vadd.f32 %v988_v18, %v939_v22  ;;  %v1820_v26 = vpop.f32.mrb[13].mxu1 }
 0x67f   : > { %v942_v28 = vpop.f32.mrb[14].mxu1 }
 0x680   : > { %v1821_v29 = vpop.f32.mrb[15].mxu1 }
 0x685   : > { %v1038_v30 = vpop.f32.mrb[16].mxu1 }
 0x686   : > { %v1832_v31 = vpop.f32.mrb[17].mxu1  ;;  %v1044_v32 = vsel %vm719_vm5, %v1038_v30, -inf }
 0x687   : > { %1045 = vmax.xlane.f32.xlu1 %v1044_v32  ;;  %v1041_v33 = vpop.f32.mrb[18].mxu1  ;;  %v1975_v32 = vld [vmem:[%s2288_s3] sm:$0xff]  }
 0x688   : > { %v1833_v34 = vpop.f32.mrb[19].mxu1  ;;  %v1976_v33 = vld [vmem:[%s2288_s3 + $0x8] sm:$0xff]  }
 0x698   : > { %1056 = vrot.lane.b32.xlu1 %v2330_v27, %s2106_s28 }
 0x69c   : > { %1157 = vrot.lane.b32.xlu1 %v2328_v25, %s2107_s12 }
 0x714   : > { %v1046_v35 = vpop.xlane.xlu1 %1045 }
 0x715   : > { %v1047_v36 = vsub.f32 %v1038_v30, %v1046_v35 }
 0x717   : > { %v1048_v37 = vmul.f32 1.442695, %v1047_v36 }
 0x718   : > { %v1057_v38 = vpop.permute.xlu1 %1056 }
 0x719   : > { %1991 = vpow2.f32 %v1048_v37  ;;  %v1062_v39 = vsel %vm735_vm3, %v1057_v38, 0  ;;  %v1739_v37 = vld [vmem:[%s538_s23] ss:$0 sm:$0xff] }
 0x71a   : > { %1835 = vmatpush3.bf16.msra.mxu0 %v1062_v39  ;;  %v1740_v39 = vld [vmem:[%s541_s19] ss:$0 sm:$0xff] }
 0x71b   : > { %1846 = vmatprep.subr.bf16.mxu0 %v2100_v23 }
 0x71c   : > { %v1158_v48 = vpop.permute.xlu1 %1157 }
 0x723   : > { %v1992_v40 = vpop.eup %1991 }
 0x724   : > { %v1050_v41 = vsel %vm719_vm5, %v1992_v40, 0.0 }
 0x725   : > { %1051 = vadd.xlane.f32.xlu0 %v1050_v41 }
 0x73b   : > { %1159 = vrot.lane.b32.xlu0 %v2328_v25, %s2108_s0  ;;  %v1973_v25 = vld [vmem:[%s2270_s21 + $0x10] sm:$0xff]  }
 0x73c   : > { %1841 = vmatpush3.bf16.msra.mxu1 %v1973_v25 }
 0x73d   : > { %1852 = vmatprep.subr.bf16.mxu1 %v2100_v23 }
 0x7b2   : > { %v1052_v42 = vpop.xlane.xlu0 %1051 }
 0x7b3   : > { %1993 = vrcp.f32 %v1052_v42 }
 0x7b6   : > { %v1160_v45 = vpop.permute.xlu0 %1159 }
 0x7b7   : > { %v1165_v47 = vsel %vm672_vm4, %v1160_v45, 0  ;;  %v1979_v45 = vld [vmem:[%s2293_s4 + $0x10] sm:$0xff]  }
 0x7bd   : > { %v1994_v43 = vpop.eup %1993 }
 0x7be   : > { %v1054_v44 = vmul.f32 %v1994_v43, %v1992_v40  ;;  %v1977_v43 = vld [vmem:[%s2293_s4] sm:$0xff]  }
 0x7c0   : > { %v1055_v46 = vpack.c.bf16 %v1054_v44, %v1054_v44  ;;  %v1978_v44 = vld [vmem:[%s2293_s4 + $0x8] sm:$0xff]  }
 0x7c2   : > { %1837 = vmatmul.mubr.msk.bf16.vlgmr.msra.gmra.mrb[12].mxu0 %vm719_vm5, %v1055_v46  ;;  %v1980_v46 = vld [vmem:[%s2293_s4 + $0x18] sm:$0xff]  }
 0x7c3   : > { %1847 = vmatpush3.bf16.xpose.msra.mxu0 %v1165_v47  ;;  %1848 = vmatprep.mubr.msk.bf16.mxu0 %vm2101_vm2, %v2100_v23  ;;  %v1741_v47 = vld [vmem:[%s549_s11] ss:$0 sm:$0xff] }
 0x7c4   : > { %1858 = vmatprep.subr.bf16.mxu0 %v2100_v23 }
 0x7ca   : > { %1849 = vmatmul.mubr.msk.bf16.vlgmr.msra.gmra.mrb[16].mxu0 %vm672_vm4, %v1158_v48 }
 0x7cb   : > { %1860 = vmatprep.mubr.msk.bf16.mxu0 %vm2101_vm2, %v2100_v23  ;;  %1859 = vmatpush3.bf16.msra.mxu0 %v1974_v3 }
 0x7cc   : > { %1872 = vmatprep.subr.bf16.mxu0 %v2100_v23 }
 0x895   : > { %v1098_v49 = vpop.f32.mrb[12].mxu0 }
 0x896   : > { %v1104_v50 = vpack.c.bf16 %v1098_v49, %v1098_v49  ;;  %v1838_v51 = vpop.f32.mrb[13].mxu0 }
 0x897   : > { %v1101_v52 = vpop.f32.mrb[14].mxu0 }
 0x898   : > { %v1839_v53 = vpop.f32.mrb[15].mxu0  ;;  %1843 = vmatmul.mubr.msk.bf16.vlgmr.msra.gmra.mrb[20].mxu1 %vm672_vm4, %v1104_v50 }
 0x899   : > { %1854 = vmatprep.mubr.msk.bf16.mxu1 %vm2101_vm2, %v2100_v23 }
 0x89d   : > { %v1201_v54 = vpop.f32.mrb[16].mxu0 }
 0x89e   : > { %v1850_v55 = vpop.f32.mrb[17].mxu0  ;;  %v1207_v56 = vsel %vm719_vm5, %v1201_v54, -inf }
 0x89f   : > { %1208 = vmax.xlane.f32.xlu1 %v1207_v56  ;;  %v1204_v57 = vpop.f32.mrb[18].mxu0 }
 0x8a0   : > { %v1851_v58 = vpop.f32.mrb[19].mxu0 }
 0x8a1   : > { %v1750_v58 = vld [vmem:[%s557_s15] ss:$0 sm:$0xff] }
 0x8b0   : > { %1219 = vrot.lane.b32.xlu1 %v2330_v27, %s2107_s12 }
 0x92c   : > { %v1209_v59 = vpop.xlane.xlu1 %1208 }
 0x92d   : > { %v1210_v60 = vsub.f32 %v1201_v54, %v1209_v59 }
 0x92f   : > { %v1211_v61 = vmul.f32 1.442695, %v1210_v60 }
 0x930   : > { %v1220_v62 = vpop.permute.xlu1 %1219 }
 0x931   : > { %1995 = vpow2.f32 %v1211_v61  ;;  %v1225_v63 = vsel %vm735_vm3, %v1220_v62, 0 }
 0x932   : > { %1853 = vmatpush3.bf16.msra.mxu1 %v1225_v63 }
 0x933   : > { %1864 = vmatprep.subr.bf16.mxu1 %v2100_v23 }
 0x93b   : > { %v1996_v0 = vpop.eup %1995 }
 0x93c   : > { %v1213_v2 = vsel %vm719_vm5, %v1996_v0, 0.0 }
 0x93d   : > { %1214 = vadd.xlane.f32.xlu0 %v1213_v2 }
 0x96b   : > { %v1150_v4 = vpop.f32.mrb[20].mxu1 }
 0x96c   : > { %v1156_v27 = vadd.f32 %v1150_v4, %v2382_v24  ;;  %v1844_v5 = vpop.f32.mrb[21].mxu1 }
 0x96d   : > { %v1153_v6 = vpop.f32.mrb[22].mxu1 }
 0x96e   : > { %v1845_v7 = vpop.f32.mrb[23].mxu1 }
 0x9ca   : > { %v1215_v8 = vpop.xlane.xlu0 %1214 }
 0x9cb   : > { %1997 = vrcp.f32 %v1215_v8 }
 0x9d5   : > { %v1998_v9 = vpop.eup %1997 }
 0x9d6   : > { %v1217_v10 = vmul.f32 %v1998_v9, %v1996_v0 }
 0x9d8   : > { %v1218_v11 = vpack.c.bf16 %v1217_v10, %v1217_v10 }
 0x9da   : > { %1855 = vmatmul.mubr.msk.bf16.vlgmr.msra.gmra.mrb[24].mxu1 %vm719_vm5, %v1218_v11 }
 0x9db   : > { %1868 = vmatprep.mubr.msk.bf16.mxu1 %vm2101_vm2, %v2100_v23  ;;  %1865 = vmatpush3.bf16.msra.mxu1 %v1975_v32 }
 0x9dc   : > { %1866 = vmatprep.subr.bf16.mxu1 %v2100_v23 }
 0x9df   : > { %1867 = vmatpush3.bf16.msra.mxu1 %v1976_v33 }
 0xaad   : > { %v1261_v12 = vpop.f32.mrb[24].mxu1 }
 0xaae   : > { %v1267_v13 = vpack.c.bf16 %v1261_v12, %v1261_v12  ;;  %v1856_v14 = vpop.f32.mrb[25].mxu1 }
 0xaaf   : > { %v1264_v15 = vpop.f32.mrb[26].mxu1 }
 0xab0   : > { %v1857_v16 = vpop.f32.mrb[27].mxu1  ;;  %1861 = vmatmul.mubr.msk.bf16.vlgmr.msra.gmra.mrb[20].mxu0 %vm672_vm4, %v1267_v13 }
 0xab1   : > { %1880 = vmatprep.mubr.msk.bf16.mxu0 %vm2101_vm2, %v2100_v23  ;;  %1873 = vmatpush3.bf16.msra.mxu0 %v1977_v43 }
 0xab2   : > { %1874 = vmatprep.subr.bf16.mxu0 %v2100_v23 }
 0xab5   : > { %1875 = vmatpush3.bf16.msra.mxu0 %v1978_v44 }
 0xab6   : > { %1876 = vmatprep.subr.bf16.mxu0 %v2100_v23 }
 0xab9   : > { %1877 = vmatpush3.bf16.msra.mxu0 %v1979_v45 }
 0xaba   : > { %1878 = vmatprep.subr.bf16.mxu0 %v2100_v23 }
 0xabd   : > { %1879 = vmatpush3.bf16.msra.mxu0 %v1980_v46 }
 0xb83   : > { %v1313_v17 = vpop.f32.mrb[20].mxu0 }
 0xb84   : > { %v1319_v18 = vadd.f32 %v1313_v17, %v1156_v27  ;;  %v1862_v19 = vpop.f32.mrb[21].mxu0 }
 0xb85   : > { %v1316_v20 = vpop.f32.mrb[22].mxu0 }
 0xb86   : > { %v1320_v21 = vadd.f32 %v1319_v18, %v2301_v1  ;;  %v1863_v22 = vpop.f32.mrb[23].mxu0 }
 0xb88   : > { %v1323_v24 = vsel %vm569_vm1, %v1320_v21, 0.0 }
 0xb89   : > { %1324 = vadd.xlane.f32.xlu0 %v1323_v24 }
 0xc16   : > { %v1325_v26 = vpop.xlane.xlu0 %1324 }
 0xc17   : > { %v1326_v28 = vmul.f32 0.03125, %v1325_v26 }
 0xc19   : > { %v1327_v29 = vsub.f32 %v1320_v21, %v1326_v28 }
 0xc1b   : > { %v1328_v30 = vmul.f32 %v1327_v29, %v1327_v29 }
 0xc1d   : > { %v1329_v31 = vsel %vm569_vm1, %v1328_v30, 0.0 }
 0xc1e   : > { %1330 = vadd.xlane.f32.xlu0 %v1329_v31 }
 0xcab   : > { %v1331_v1 = vpop.xlane.xlu0 %1330 }
 0xcac   : > { %v1332_v34 = vmul.f32 0.03125, %v1331_v1 }
 0xcae   : > { %v1333_v35 = vadd.f32 1e-05, %v1332_v34 }
 0xcb0   : > { %1999 = vrsqrt.f32 %v1333_v35 }
 0xcba   : > { %v2000_v36 = vpop.eup %1999 }
 0xcbb   : > { %v1335_v38 = vmul.f32 %v2000_v36, %v1327_v29 }
 0xcbd   : > { %v1342_v40 = vmul.f32 %v1739_v37, %v1335_v38 }
 0xcbf   : > { %v1349_v41 = vadd.f32 %v1740_v39, %v1342_v40 }
 0xcc1   : > { %v1350_v42 = vpack.c.bf16 %v1349_v41, %v1349_v41 }
 0xcc3   : > { %1869 = vmatmul.mubr.msk.bf16.vlgmr.msra.gmra.mrb[28].mxu1 %vm569_vm1, %v1350_v42 }
 0xd96   : > { %v1411_v48 = vpop.f32.mrb[28].mxu1 }
 0xd97   : > { %v1412_v25 = vadd.f32 %v1741_v47, %v1411_v48  ;;  %v1870_v49 = vpop.f32.mrb[29].mxu1 }
 0xd98   : > { %v1414_v50 = vpop.f32.mrb[30].mxu1 }
 0xd99   : > { %v1418_v51 = vmul.f32 0.70710677, %v1412_v25  ;;  %v1871_v52 = vpop.f32.mrb[31].mxu1  ;;  %v1417_v54 = vmul.f32 0.5, %v1412_v25 }
 0xd9b   : > { %2001 = verf.f32 %v1418_v51 }
 0xda5   : > { %v2002_v53 = vpop.eup %2001 }
 0xda6   : > { %v1420_v55 = vadd.f32 1.0, %v2002_v53 }
 0xda8   : > { %v1421_v56 = vmul.f32 %v1420_v55, %v1417_v54 }
 0xdaa   : > { %v1422_v23 = vpack.c.bf16 %v1421_v56, %v1421_v56 }
 0xdac   : > { %1881 = vmatmul.mubr.msk.bf16.vlgmr.msra.gmra.mrb[24].mxu0 %vm1455_vm6, %v1422_v23 }
 0xe7e   : > { %1512 = sbr.rel (%p1751_p1) target bundleno = 3717 (0xe85), region = 72 }
 0xe7f   : > { %v1493_v57 = vpop.f32.mrb[24].mxu0 }
 0xe80   : > { %v1499_v59 = vadd.f32 %v1493_v57, %v1320_v21  ;;  %v1882_v60 = vpop.f32.mrb[25].mxu0 }
 0xe81   : > { %v1496_v61 = vpop.f32.mrb[26].mxu0 }
 0xe82   : > { %v1507_v62 = vadd.f32 %v1750_v58, %v1499_v59  ;;  %v1883_v63 = vpop.f32.mrb[27].mxu0 }
 0xe84   : > { %1508 = vst.msk [vmem:[#allocation2] sm:$0xff] %vm569_vm1, %v1507_v62  ;;  %1513 = vst.msk [vmem:[%s515_s13] sm:$0xff] (!%p1751_p1), %vm569_vm1, %v1507_v62 }
 0xe85 PF: > { %s2564_s11 = sld [smem:[#allocation9_spill]]  ;;  %s2567_s24 = sld [smem:[#allocation21_spill]] }
 0xe86   : > { %s2565_s30 = sld [smem:[#allocation7_spill]]  ;;  %s1528_s28 = sshll.u32 %s515_s13, 4  ;;  %s1529_s28 = int_to_ptr.vmem [resolvable:$true] %s1528_s28 }
 0xe87   : > { %s2003_s0 = scalar_lea.vmem %s1529_s28, 128  ;;  %s2109_s21 = smov [#allocation3]  }
 0xe88   : > { %p2004_p2 = scmp.ne.s32.totalorder %s1529_s28, %s2003_s0  ;;  %s2007_s17 = sshll.u32 %s2109_s21, 4  ;;  %s2008_s17 = int_to_ptr.vmem [resolvable:$false] %s2007_s17 }
 0xe89   : > { %s2009_s22 = scalar_lea.vmem %s2008_s17, 256  ;;  %p2010_p6 = scmp.lt.s32.totalorder %s1529_s28, %s2008_s17 }
 0xe8a   : > { %p2005_p4 = pnand %p2004_p2, %p2219_p3  ;;  %p2011_p7 = scmp.lt.s32.totalorder %s2009_s22, %s2003_s0 }
 0xe8b   : > { %s1753_s15 = sshll.u32 %s2564_s11, 7  ;;  %s2568_s25 = smov %s2567_s24 }
 0xe8c   : > { %s2464_s18 = scalar_lea.hbm %s2567_s24, %s1753_s15  ;;  %s2569_s20 = sand.u32 1, %s2565_s30  }
 0xe8d   : > { %s1515_s12 = scalar_lea.sflag [#allocation4], %s2569_s20  ;;  %p2006_p5 = pneg %p2005_p4 }
 0xe8e   : > { %p2012_p8 = por %p2011_p7, %p2010_p6 }
 0xe90   : > { %p2013_p10 = pnand %p2012_p8, %p2006_p5 }
 0xe92   : > { %2016 = shalt.err (!%p2013_p10)
}
 0xe93   : > { %s2017_s16 = scalar_lea.hbm %s2464_s18, 128  ;;  %s2021_s3 = scalar_lea.hbm %s2568_s25, 256 }
 0xe94   : > { %p2018_p11 = scmp.ne.s32.totalorder %s2464_s18, %s2017_s16  ;;  %p2022_p0 = scmp.lt.u32.totalorder %s2464_s18, %s2568_s25 }
 0xe95   : > { %p2023_p1 = scmp.lt.u32.totalorder %s2021_s3, %s2017_s16  ;;  %p2025_p4 = scmp.lt.u32.totalorder %s2017_s16, %s2464_s18 }
 0xe96   : > { %p2019_p12 = pnand %p2018_p11, %p2219_p3 }
 0xe97   : > { %p2024_p2 = por %p2023_p1, %p2022_p0 }
 0xe98   : > { %p2020_p13 = pneg %p2019_p12 }
 0xe99   : > { %p2026_p5 = por %p2025_p4, %p2024_p2 }
 0xe9b   : > { %p2027_p6 = pnand %p2026_p5, %p2020_p13 }
 0xe9d   : > { %2030 = shalt.err (!%p2027_p6)
}
 0xe9e   : > { %1884 = dma.vmem_to_hbm [thread:$0]  (%p2219_p3), %s1529_s28, 128, %s2464_s18, %s1515_s12  }
 0xe9f PF: > { %s2570_s19 = sld [smem:[#allocation12_spill]]  ;;  %s2571_s11 = sld [smem:[#allocation6_spill]] }
 0xea5   : > { %p1890_p7 = scmp.ge.s32.totalorder %s2570_s19, 2  ;;  %s1540_s15 = sand.u32 1, %s2571_s11  }
 0xea6   : > { %s1541_s14 = scalar_lea.sflag [#allocation4], %s1540_s15 }
 0xea7   : > { %p1887_p8 = pnand %p1890_p7, %p2229_p9 }
 0xea9   : > { %2064 = dma.done.wait (!%p1887_p8), %s1541_s14, 128  }
 0xeaa   : > { %2066 = vsyncadd (!%p1887_p8), %s1541_s14, 4294967168  ;;  %s24_s24 = sadd.s32 1, %s2570_s19   ;;  %s2573_s17 = sld [smem:[#allocation7_spill]] }
 0xeab   : > { %p21_p10 = scmp.ge.s32.totalorder %s24_s24, 6   ;;  %s2574_s18 = sld [smem:[#allocation8_spill]] }
 0xeac   : > { %s2575_s19 = sld [smem:[#allocation17_spill]]  ;;  %s2576_s20 = sld [smem:[#allocation10_spill]] }
 0xead   : > { %s2577_s21 = sld [smem:[#allocation11_spill]]  ;;  %s2578_s22 = sld [smem:[#allocation13_spill]] }
 0xeae   : > { %s2579_s23 = sld [smem:[#allocation15_spill]]  ;;  %23 = sbr.rel (!%p21_p10) target bundleno = 10 (0xa), region = 137 }
 0xeb5   :  { %1546 = vsyncpa [#allocation4], 1 }
 0xeb6   :  { %1548 = vsyncpa [#allocation4 + $0x1], 1 }

</bundles_post_ra>
